<compile_context>
chip_gen: v6e
topology: v6e:2x2x1
jax: 0.10.0
libtpu: 0.0.40
codegen_flags: <defaults>
</compile_context>

<pallas_src>
import jax
import jax.numpy as jnp
from jax.experimental import pallas as pl
from jax.experimental.pallas import tpu as pltpu


def spatial_softmax_kernel(x_ref, w_ref, p_ref, out_ref):
    """One grid step = TB batch rows of the spatial-softmax head.

    x_ref  : (TB, C*HWp) VMEM, input dtype.  Lane-dense: channel c occupies
             lanes [c*HWp, (c+1)*HWp), HWp % 128 == 0, so no sublane padding.
    w_ref  : (K, C) SMEM f32 1x1-conv weight (bias dropped: softmax over HW is
             invariant to a per-(b, k) shift).
    p_ref  : (HWp, 128) VMEM f32 reduction matrix: col 0 = ones, col 1 = pos_x,
             col 2 = pos_y on real HW rows, zeros elsewhere (padded positions
             therefore contribute nothing to any sum).
    out_ref: (1, K*TB, 128) f32.  Row k*TB + t, lanes 0..2 hold the
             un-normalised (sum e, sum e*pos_x, sum e*pos_y) for batch row t,
             keypoint k.  128-lane-wide so the store is an unmasked vst.
    """
    TB = x_ref.shape[0]
    K, C = w_ref.shape
    HWp = p_ref.shape[0]

    # Per-channel lane-aligned slices; single f32 upcast of the streamed block.
    xc = [x_ref[:, c * HWp:(c + 1) * HWp].astype(jnp.float32) for c in range(C)]

    # 1x1 conv as an unrolled C-step VPU MAC with SMEM scalar weights.
    rows = []
    for k in range(K):
        hk = xc[0] * w_ref[k, 0]
        for c in range(1, C):
            hk = hk + xc[c] * w_ref[k, c]
        rows.append(hk)                                    # (TB, HWp) f32
    # TB is a multiple of 8 -> tile-aligned sublane concatenation.
    h = jnp.concatenate(rows, axis=0)                      # (K*TB, HWp)

    # Coarse per-tile stability max (softmax is shift-invariant per row):
    # replaces K*TB per-row XLU reductions with VALU folds + one reduce.
    m = jnp.max(h)

    e = jnp.exp(h - m)                                     # (K*TB, HWp)

    # All three HW reductions in one MXU matmul against the constant matrix;
    # normalisation is deferred to the wrapper (touches only (B, K) numbers).
    out_ref[0] = jnp.dot(e, p_ref[...], preferred_element_type=jnp.float32)


def _plan_tiles(B, x_row_bytes, work_row_bytes, fixed_bytes, *,
                target_block_bytes, footprint_cap_bytes):
    """Pick (TB, NB) for the 1-D batch grid.

    TB is a multiple of 8 (sublane alignment), sized so the x block stays under
    `target_block_bytes` and the full working set (2 double-buffered x blocks +
    f32 intermediates + constants) stays under `footprint_cap_bytes`.  Tiny
    problems run as a single grid step; otherwise NB is rounded up to an even
    count so v7x's two TensorCores stay balanced.  Uses cdiv + batch padding,
    so awkward B never collapses TB to 1.
    """
    per_row = 2 * x_row_bytes + work_row_bytes
    cap_block = max(1, target_block_bytes // x_row_bytes)
    cap_footprint = max(1, (footprint_cap_bytes - fixed_bytes) // per_row)
    tb_cap = max(8, (min(cap_block, cap_footprint) // 8) * 8)

    b8 = pl.cdiv(B, 8) * 8
    if b8 <= tb_cap:
        return b8, 1                      # whole problem in one grid step
    nb = pl.cdiv(b8, tb_cap)
    nb = nb + (nb % 2)                    # even NB for v7x's two TensorCores
    tb = pl.cdiv(pl.cdiv(b8, 8), nb) * 8
    return tb, nb


def spatial_softmax(x, weight, bias=None, pos=None, *,
                    target_block_bytes=4 << 20,
                    footprint_cap_bytes=20 << 20):
    """DSAE spatial-softmax keypoints.

    x: (B, C, H, W) feature map (streamed in its own dtype); weight: (K, C)
    1x1-conv weight; bias: (K,) accepted but unused (softmax over HW is
    shift-invariant); pos: (2, H*W) with row 0 = pos_x, row 1 = pos_y.
    Returns (B, 2K) f32 in torch layout [kx_0..kx_{K-1}, ky_0..ky_{K-1}].
    """
    del bias  # mathematically a no-op for the keypoints
    B, C, H, W = x.shape
    K = weight.shape[0]
    HW = H * W
    HWp = pl.cdiv(HW, 128) * 128

    # Lane-dense activation layout (contiguous reshape).  HW padding (e.g.
    # 196 -> 256 for a 14x14 ViT map) is zero-filled; the matching zero rows of
    # the reduction matrix keep padded positions out of every sum.
    x3 = x.reshape(B, C, HW)
    if HWp != HW:
        x3 = jnp.pad(x3, ((0, 0), (0, 0), (0, HWp - HW)))
    x2 = x3.reshape(B, C * HWp)

    itemsize = x2.dtype.itemsize
    x_row_bytes = C * HWp * itemsize
    work_row_bytes = (C + 2 * K) * HWp * 4        # f32 channel slices + h + e
    fixed_bytes = HWp * 128 * 4                   # reduction matrix
    TB, NB = _plan_tiles(B, x_row_bytes, work_row_bytes, fixed_bytes,
                         target_block_bytes=target_block_bytes,
                         footprint_cap_bytes=footprint_cap_bytes)
    Bp = NB * TB
    if Bp != B:
        x2 = jnp.pad(x2, ((0, Bp - B), (0, 0)))

    # Constant reduction matrix: cols 0/1/2 = ones / pos_x / pos_y.
    pcols = jnp.stack([jnp.ones((HW,), jnp.float32),
                       pos[0].astype(jnp.float32),
                       pos[1].astype(jnp.float32)], axis=1)       # (HW, 3)
    pmat = jnp.zeros((HWp, 128), jnp.float32).at[:HW, :3].set(pcols)

    out_block_bytes = K * TB * 128 * 4
    footprint = (2 * TB * x_row_bytes + TB * work_row_bytes
                 + 2 * fixed_bytes + 2 * out_block_bytes)
    vmem_limit = int(min(max(footprint + (6 << 20), 16 << 20), 48 << 20))

    cost = pl.CostEstimate(
        flops=2 * Bp * K * HWp * (C + 128),
        transcendentals=Bp * K * HWp,
        bytes_accessed=(Bp * C * HWp * itemsize + HWp * 128 * 4
                        + K * C * 4 + NB * K * TB * 128 * 4),
    )

    raw = pl.pallas_call(
        spatial_softmax_kernel,
        out_shape=jax.ShapeDtypeStruct((NB, K * TB, 128), jnp.float32),
        grid_spec=pltpu.PrefetchScalarGridSpec(
            num_scalar_prefetch=0,
            grid=(NB,),
            in_specs=[
                pl.BlockSpec((TB, C * HWp), lambda b: (b, 0)),       # activations
                pl.BlockSpec(memory_space=pltpu.MemorySpace.SMEM),   # conv weight
                pl.BlockSpec((HWp, 128), lambda b: (0, 0)),          # reduction mat
            ],
            out_specs=pl.BlockSpec((1, K * TB, 128), lambda b: (b, 0, 0)),
        ),
        compiler_params=pltpu.CompilerParams(
            dimension_semantics=("parallel",),
            vmem_limit_bytes=vmem_limit,
        ),
        cost_estimate=cost,
    )(x2, weight.astype(jnp.float32), pmat)

    # Tiny (B, K)-sized epilogue: exact normalisation (no approx reciprocal)
    # plus the torch [kx..., ky...] axis-order fix.
    r = raw.reshape(NB, K, TB, 128)
    r = jnp.moveaxis(r, 2, 1).reshape(Bp, K, 128)[:B]     # (B, K, 128)
    s = r[:, :, 0]
    kx = r[:, :, 1] / s
    ky = r[:, :, 2] / s
    return jnp.concatenate([kx, ky], axis=1)


def reference(x, weight, bias, pos):
    """Pure-JAX reference mirroring the PyTorch SpatialSoftmax forward
    (including the bias, which is a softmax no-op)."""
    B, C, H, W = x.shape
    K = weight.shape[0]
    h = jnp.einsum("kc,bchw->bkhw", weight.astype(jnp.float32),
                   x.astype(jnp.float32)) + bias[None, :, None, None]
    h = h.reshape(B * K, H * W)
    att = jax.nn.softmax(h, axis=-1)
    kx = jnp.sum(pos[0][None, :] * att, axis=1).reshape(B, K)
    ky = jnp.sum(pos[1][None, :] * att, axis=1).reshape(B, K)
    return jnp.concatenate([kx, ky], axis=1)


if __name__ == "__main__":
    B, in_c, in_h, in_w, num_kp = 2, 4, 16, 16, 8

    key = jax.random.PRNGKey(0)
    kx_, kw_, kb_ = jax.random.split(key, 3)

    x = jax.random.normal(kx_, (B, in_c, in_h, in_w), dtype=jnp.float32)

    # Deterministic 1x1-conv parameters (shapes from nn.Conv2d(in_c, num_kp, 1)).
    bound = 1.0 / (in_c ** 0.5)
    weight = jax.random.uniform(kw_, (num_kp, in_c), jnp.float32, -bound, bound)
    bias = jax.random.uniform(kb_, (num_kp,), jnp.float32, -bound, bound)

    # pos buffers, reproducing torch.meshgrid(linspace(w), linspace(h)) with
    # default 'ij' indexing followed by .reshape(1, in_w * in_h):
    #   pos_x_flat[k] = linspace_w[k // in_h], pos_y_flat[k] = linspace_h[k % in_h]
    lin_w = jnp.linspace(-1.0, 1.0, in_w, dtype=jnp.float32)
    lin_h = jnp.linspace(-1.0, 1.0, in_h, dtype=jnp.float32)
    pos_x = jnp.repeat(lin_w, in_h)           # (in_w * in_h,)
    pos_y = jnp.tile(lin_h, in_w)             # (in_w * in_h,)
    pos = jnp.stack([pos_x, pos_y], axis=0)   # (2, HW)

    out = spatial_softmax(x, weight, bias, pos)
    out = jax.block_until_ready(out)

    ref = reference(x, weight, bias, pos)
    assert out.shape == (B, 2 * num_kp), out.shape
    # Exact reciprocal now; the only approximation left is MXU accumulation of
    # the e @ P reduction matmul, so the tolerance is tighter than before.
    assert jnp.allclose(out, ref, atol=1e-3, rtol=1e-3), (
        float(jnp.max(jnp.abs(out - ref))))

    print("KERNEL_OK")
</pallas_src>

<mosaic_0001>
module attributes {stable_mosaic.version = 11 : i64} {
  func.func @spatial_softmax_kernel(%arg0: i32, %arg1: memref<8x1024xf32, #tpu.memory_space<vmem>>, %arg2: memref<8x4xf32, #tpu.memory_space<smem>>, %arg3: memref<256x128xf32, #tpu.memory_space<vmem>>, %arg4: memref<1x64x128xf32, #tpu.memory_space<vmem>>) attributes {dimension_semantics = [#tpu.dimension_semantics<parallel>], iteration_bounds = array<i64: 1>, scalar_prefetch = 0 : i64, scratch_operands = 0 : i64, tpu.core_type = #tpu.core_type<tc>, window_params = [{transform_indices = @transform_0, window_bounds = array<i64: 8, 1024>}, {transform_indices = @transform_1, window_bounds = array<i64: 8, 4>}, {pipeline_mode = #tpu.pipeline_mode<synchronous>, transform_indices = @transform_2, window_bounds = array<i64: 256, 128>}, {transform_indices = @transform_3, window_bounds = array<i64: 1, 64, 128>}]} {
    %c0 = arith.constant 0 : index
    %c0_0 = arith.constant 0 : index
    %0 = vector.load %arg1[%c0, %c0_0] : memref<8x1024xf32, #tpu.memory_space<vmem>>, vector<8x256xf32>
    %c0_1 = arith.constant 0 : index
    %c256 = arith.constant 256 : index
    %1 = vector.load %arg1[%c0_1, %c256] : memref<8x1024xf32, #tpu.memory_space<vmem>>, vector<8x256xf32>
    %c0_2 = arith.constant 0 : index
    %c512 = arith.constant 512 : index
    %2 = vector.load %arg1[%c0_2, %c512] : memref<8x1024xf32, #tpu.memory_space<vmem>>, vector<8x256xf32>
    %c0_3 = arith.constant 0 : index
    %c768 = arith.constant 768 : index
    %3 = vector.load %arg1[%c0_3, %c768] : memref<8x1024xf32, #tpu.memory_space<vmem>>, vector<8x256xf32>
    %c0_4 = arith.constant 0 : index
    %c0_5 = arith.constant 0 : index
    %4 = memref.load %arg2[%c0_4, %c0_5] : memref<8x4xf32, #tpu.memory_space<smem>>
    %5 = vector.broadcast %4 : f32 to vector<8x256xf32>
    %6 = arith.mulf %0, %5 : vector<8x256xf32>
    %c0_6 = arith.constant 0 : index
    %c1 = arith.constant 1 : index
    %7 = memref.load %arg2[%c0_6, %c1] : memref<8x4xf32, #tpu.memory_space<smem>>
    %8 = vector.broadcast %7 : f32 to vector<8x256xf32>
    %9 = arith.mulf %1, %8 : vector<8x256xf32>
    %10 = arith.addf %6, %9 : vector<8x256xf32>
    %c0_7 = arith.constant 0 : index
    %c2 = arith.constant 2 : index
    %11 = memref.load %arg2[%c0_7, %c2] : memref<8x4xf32, #tpu.memory_space<smem>>
    %12 = vector.broadcast %11 : f32 to vector<8x256xf32>
    %13 = arith.mulf %2, %12 : vector<8x256xf32>
    %14 = arith.addf %10, %13 : vector<8x256xf32>
    %c0_8 = arith.constant 0 : index
    %c3 = arith.constant 3 : index
    %15 = memref.load %arg2[%c0_8, %c3] : memref<8x4xf32, #tpu.memory_space<smem>>
    %16 = vector.broadcast %15 : f32 to vector<8x256xf32>
    %17 = arith.mulf %3, %16 : vector<8x256xf32>
    %18 = arith.addf %14, %17 : vector<8x256xf32>
    %c1_9 = arith.constant 1 : index
    %c0_10 = arith.constant 0 : index
    %19 = memref.load %arg2[%c1_9, %c0_10] : memref<8x4xf32, #tpu.memory_space<smem>>
    %20 = vector.broadcast %19 : f32 to vector<8x256xf32>
    %21 = arith.mulf %0, %20 : vector<8x256xf32>
    %c1_11 = arith.constant 1 : index
    %c1_12 = arith.constant 1 : index
    %22 = memref.load %arg2[%c1_11, %c1_12] : memref<8x4xf32, #tpu.memory_space<smem>>
    %23 = vector.broadcast %22 : f32 to vector<8x256xf32>
    %24 = arith.mulf %1, %23 : vector<8x256xf32>
    %25 = arith.addf %21, %24 : vector<8x256xf32>
    %c1_13 = arith.constant 1 : index
    %c2_14 = arith.constant 2 : index
    %26 = memref.load %arg2[%c1_13, %c2_14] : memref<8x4xf32, #tpu.memory_space<smem>>
    %27 = vector.broadcast %26 : f32 to vector<8x256xf32>
    %28 = arith.mulf %2, %27 : vector<8x256xf32>
    %29 = arith.addf %25, %28 : vector<8x256xf32>
    %c1_15 = arith.constant 1 : index
    %c3_16 = arith.constant 3 : index
    %30 = memref.load %arg2[%c1_15, %c3_16] : memref<8x4xf32, #tpu.memory_space<smem>>
    %31 = vector.broadcast %30 : f32 to vector<8x256xf32>
    %32 = arith.mulf %3, %31 : vector<8x256xf32>
    %33 = arith.addf %29, %32 : vector<8x256xf32>
    %c2_17 = arith.constant 2 : index
    %c0_18 = arith.constant 0 : index
    %34 = memref.load %arg2[%c2_17, %c0_18] : memref<8x4xf32, #tpu.memory_space<smem>>
    %35 = vector.broadcast %34 : f32 to vector<8x256xf32>
    %36 = arith.mulf %0, %35 : vector<8x256xf32>
    %c2_19 = arith.constant 2 : index
    %c1_20 = arith.constant 1 : index
    %37 = memref.load %arg2[%c2_19, %c1_20] : memref<8x4xf32, #tpu.memory_space<smem>>
    %38 = vector.broadcast %37 : f32 to vector<8x256xf32>
    %39 = arith.mulf %1, %38 : vector<8x256xf32>
    %40 = arith.addf %36, %39 : vector<8x256xf32>
    %c2_21 = arith.constant 2 : index
    %c2_22 = arith.constant 2 : index
    %41 = memref.load %arg2[%c2_21, %c2_22] : memref<8x4xf32, #tpu.memory_space<smem>>
    %42 = vector.broadcast %41 : f32 to vector<8x256xf32>
    %43 = arith.mulf %2, %42 : vector<8x256xf32>
    %44 = arith.addf %40, %43 : vector<8x256xf32>
    %c2_23 = arith.constant 2 : index
    %c3_24 = arith.constant 3 : index
    %45 = memref.load %arg2[%c2_23, %c3_24] : memref<8x4xf32, #tpu.memory_space<smem>>
    %46 = vector.broadcast %45 : f32 to vector<8x256xf32>
    %47 = arith.mulf %3, %46 : vector<8x256xf32>
    %48 = arith.addf %44, %47 : vector<8x256xf32>
    %c3_25 = arith.constant 3 : index
    %c0_26 = arith.constant 0 : index
    %49 = memref.load %arg2[%c3_25, %c0_26] : memref<8x4xf32, #tpu.memory_space<smem>>
    %50 = vector.broadcast %49 : f32 to vector<8x256xf32>
    %51 = arith.mulf %0, %50 : vector<8x256xf32>
    %c3_27 = arith.constant 3 : index
    %c1_28 = arith.constant 1 : index
    %52 = memref.load %arg2[%c3_27, %c1_28] : memref<8x4xf32, #tpu.memory_space<smem>>
    %53 = vector.broadcast %52 : f32 to vector<8x256xf32>
    %54 = arith.mulf %1, %53 : vector<8x256xf32>
    %55 = arith.addf %51, %54 : vector<8x256xf32>
    %c3_29 = arith.constant 3 : index
    %c2_30 = arith.constant 2 : index
    %56 = memref.load %arg2[%c3_29, %c2_30] : memref<8x4xf32, #tpu.memory_space<smem>>
    %57 = vector.broadcast %56 : f32 to vector<8x256xf32>
    %58 = arith.mulf %2, %57 : vector<8x256xf32>
    %59 = arith.addf %55, %58 : vector<8x256xf32>
    %c3_31 = arith.constant 3 : index
    %c3_32 = arith.constant 3 : index
    %60 = memref.load %arg2[%c3_31, %c3_32] : memref<8x4xf32, #tpu.memory_space<smem>>
    %61 = vector.broadcast %60 : f32 to vector<8x256xf32>
    %62 = arith.mulf %3, %61 : vector<8x256xf32>
    %63 = arith.addf %59, %62 : vector<8x256xf32>
    %c4 = arith.constant 4 : index
    %c0_33 = arith.constant 0 : index
    %64 = memref.load %arg2[%c4, %c0_33] : memref<8x4xf32, #tpu.memory_space<smem>>
    %65 = vector.broadcast %64 : f32 to vector<8x256xf32>
    %66 = arith.mulf %0, %65 : vector<8x256xf32>
    %c4_34 = arith.constant 4 : index
    %c1_35 = arith.constant 1 : index
    %67 = memref.load %arg2[%c4_34, %c1_35] : memref<8x4xf32, #tpu.memory_space<smem>>
    %68 = vector.broadcast %67 : f32 to vector<8x256xf32>
    %69 = arith.mulf %1, %68 : vector<8x256xf32>
    %70 = arith.addf %66, %69 : vector<8x256xf32>
    %c4_36 = arith.constant 4 : index
    %c2_37 = arith.constant 2 : index
    %71 = memref.load %arg2[%c4_36, %c2_37] : memref<8x4xf32, #tpu.memory_space<smem>>
    %72 = vector.broadcast %71 : f32 to vector<8x256xf32>
    %73 = arith.mulf %2, %72 : vector<8x256xf32>
    %74 = arith.addf %70, %73 : vector<8x256xf32>
    %c4_38 = arith.constant 4 : index
    %c3_39 = arith.constant 3 : index
    %75 = memref.load %arg2[%c4_38, %c3_39] : memref<8x4xf32, #tpu.memory_space<smem>>
    %76 = vector.broadcast %75 : f32 to vector<8x256xf32>
    %77 = arith.mulf %3, %76 : vector<8x256xf32>
    %78 = arith.addf %74, %77 : vector<8x256xf32>
    %c5 = arith.constant 5 : index
    %c0_40 = arith.constant 0 : index
    %79 = memref.load %arg2[%c5, %c0_40] : memref<8x4xf32, #tpu.memory_space<smem>>
    %80 = vector.broadcast %79 : f32 to vector<8x256xf32>
    %81 = arith.mulf %0, %80 : vector<8x256xf32>
    %c5_41 = arith.constant 5 : index
    %c1_42 = arith.constant 1 : index
    %82 = memref.load %arg2[%c5_41, %c1_42] : memref<8x4xf32, #tpu.memory_space<smem>>
    %83 = vector.broadcast %82 : f32 to vector<8x256xf32>
    %84 = arith.mulf %1, %83 : vector<8x256xf32>
    %85 = arith.addf %81, %84 : vector<8x256xf32>
    %c5_43 = arith.constant 5 : index
    %c2_44 = arith.constant 2 : index
    %86 = memref.load %arg2[%c5_43, %c2_44] : memref<8x4xf32, #tpu.memory_space<smem>>
    %87 = vector.broadcast %86 : f32 to vector<8x256xf32>
    %88 = arith.mulf %2, %87 : vector<8x256xf32>
    %89 = arith.addf %85, %88 : vector<8x256xf32>
    %c5_45 = arith.constant 5 : index
    %c3_46 = arith.constant 3 : index
    %90 = memref.load %arg2[%c5_45, %c3_46] : memref<8x4xf32, #tpu.memory_space<smem>>
    %91 = vector.broadcast %90 : f32 to vector<8x256xf32>
    %92 = arith.mulf %3, %91 : vector<8x256xf32>
    %93 = arith.addf %89, %92 : vector<8x256xf32>
    %c6 = arith.constant 6 : index
    %c0_47 = arith.constant 0 : index
    %94 = memref.load %arg2[%c6, %c0_47] : memref<8x4xf32, #tpu.memory_space<smem>>
    %95 = vector.broadcast %94 : f32 to vector<8x256xf32>
    %96 = arith.mulf %0, %95 : vector<8x256xf32>
    %c6_48 = arith.constant 6 : index
    %c1_49 = arith.constant 1 : index
    %97 = memref.load %arg2[%c6_48, %c1_49] : memref<8x4xf32, #tpu.memory_space<smem>>
    %98 = vector.broadcast %97 : f32 to vector<8x256xf32>
    %99 = arith.mulf %1, %98 : vector<8x256xf32>
    %100 = arith.addf %96, %99 : vector<8x256xf32>
    %c6_50 = arith.constant 6 : index
    %c2_51 = arith.constant 2 : index
    %101 = memref.load %arg2[%c6_50, %c2_51] : memref<8x4xf32, #tpu.memory_space<smem>>
    %102 = vector.broadcast %101 : f32 to vector<8x256xf32>
    %103 = arith.mulf %2, %102 : vector<8x256xf32>
    %104 = arith.addf %100, %103 : vector<8x256xf32>
    %c6_52 = arith.constant 6 : index
    %c3_53 = arith.constant 3 : index
    %105 = memref.load %arg2[%c6_52, %c3_53] : memref<8x4xf32, #tpu.memory_space<smem>>
    %106 = vector.broadcast %105 : f32 to vector<8x256xf32>
    %107 = arith.mulf %3, %106 : vector<8x256xf32>
    %108 = arith.addf %104, %107 : vector<8x256xf32>
    %c7 = arith.constant 7 : index
    %c0_54 = arith.constant 0 : index
    %109 = memref.load %arg2[%c7, %c0_54] : memref<8x4xf32, #tpu.memory_space<smem>>
    %110 = vector.broadcast %109 : f32 to vector<8x256xf32>
    %111 = arith.mulf %0, %110 : vector<8x256xf32>
    %c7_55 = arith.constant 7 : index
    %c1_56 = arith.constant 1 : index
    %112 = memref.load %arg2[%c7_55, %c1_56] : memref<8x4xf32, #tpu.memory_space<smem>>
    %113 = vector.broadcast %112 : f32 to vector<8x256xf32>
    %114 = arith.mulf %1, %113 : vector<8x256xf32>
    %115 = arith.addf %111, %114 : vector<8x256xf32>
    %c7_57 = arith.constant 7 : index
    %c2_58 = arith.constant 2 : index
    %116 = memref.load %arg2[%c7_57, %c2_58] : memref<8x4xf32, #tpu.memory_space<smem>>
    %117 = vector.broadcast %116 : f32 to vector<8x256xf32>
    %118 = arith.mulf %2, %117 : vector<8x256xf32>
    %119 = arith.addf %115, %118 : vector<8x256xf32>
    %c7_59 = arith.constant 7 : index
    %c3_60 = arith.constant 3 : index
    %120 = memref.load %arg2[%c7_59, %c3_60] : memref<8x4xf32, #tpu.memory_space<smem>>
    %121 = vector.broadcast %120 : f32 to vector<8x256xf32>
    %122 = arith.mulf %3, %121 : vector<8x256xf32>
    %123 = arith.addf %119, %122 : vector<8x256xf32>
    %124 = tpu.concatenate %18, %33, %48, %63, %78, %93, %108, %123 in 0 : vector<8x256xf32>, vector<8x256xf32>, vector<8x256xf32>, vector<8x256xf32>, vector<8x256xf32>, vector<8x256xf32>, vector<8x256xf32>, vector<8x256xf32> -> vector<64x256xf32>
    %125 = vector.shape_cast %124 : vector<64x256xf32> to vector<1x64x256xf32>
    %cst = arith.constant dense<0xFF800000> : vector<1xf32>
    %126 = vector.multi_reduction <maximumf>, %125, %cst [1, 2] : vector<1x64x256xf32> to vector<1xf32>
    %127 = vector.shape_cast %126 : vector<1xf32> to vector<1x1x1xf32>
    %128 = vector.extract %127[0, 0, 0] : f32 from vector<1x1x1xf32>
    %129 = vector.broadcast %128 : f32 to vector<64x256xf32>
    %130 = arith.subf %124, %129 : vector<64x256xf32>
    %131 = math.exp %130 : vector<64x256xf32>
    %c0_61 = arith.constant 0 : index
    %c0_62 = arith.constant 0 : index
    %132 = vector.load %arg3[%c0_61, %c0_62] : memref<256x128xf32, #tpu.memory_space<vmem>>, vector<256x128xf32>
    %cst_63 = arith.constant dense<0.000000e+00> : vector<64x128xf32>
    %133 = tpu.matmul %131, %132, %cst_63 {dimension_numbers = #tpu.dot_dimension_numbers<[1], [0], [0], [1], [0, 0, 1, 1], [], []>} : vector<64x256xf32>, vector<256x128xf32>, vector<64x128xf32> -> vector<64x128xf32>
    %c0_64 = arith.constant 0 : index
    %c0_65 = arith.constant 0 : index
    %c0_66 = arith.constant 0 : index
    %134 = vector.load %arg4[%c0_64, %c0_65, %c0_66] : memref<1x64x128xf32, #tpu.memory_space<vmem>>, vector<1x64x128xf32>
    %135 = vector.shape_cast %134 : vector<1x64x128xf32> to vector<64x128xf32>
    %136 = vector.shape_cast %133 : vector<64x128xf32> to vector<1x64x128xf32>
    tpu.vector_store %arg4[%c0_64, %c0_65, %c0_66], %136 {strides = array<i32>} : memref<1x64x128xf32, #tpu.memory_space<vmem>>, vector<1x64x128xf32>,
    return
  }
  func.func @transform_0(%arg0: i32) -> (i32, i32) {
    %c0_i32 = arith.constant 0 : i32
    %c0_i32_0 = arith.constant 0 : i32
    return %arg0, %c0_i32 : i32, i32
  }
  func.func @transform_1(%arg0: i32) -> (i32, i32) {
    %c0_i32 = arith.constant 0 : i32
    %c0_i32_0 = arith.constant 0 : i32
    %c0_i32_1 = arith.constant 0 : i32
    return %c0_i32, %c0_i32_0 : i32, i32
  }
  func.func @transform_2(%arg0: i32) -> (i32, i32) {
    %c0_i32 = arith.constant 0 : i32
    %c0_i32_0 = arith.constant 0 : i32
    %c0_i32_1 = arith.constant 0 : i32
    return %c0_i32, %c0_i32_0 : i32, i32
  }
  func.func @transform_3(%arg0: i32) -> (i32, i32, i32) {
    %c0_i32 = arith.constant 0 : i32
    %c0_i32_0 = arith.constant 0 : i32
    %c0_i32_1 = arith.constant 0 : i32
    return %arg0, %c0_i32, %c0_i32_0 : i32, i32, i32
  }
}

</mosaic_0001>

<bundles_post_ra>
// kernel: tpu_custom_call.1
= control target key start
LH: loop header
LB: loop body
LE: loop exit
PB: predicated region body
PF: predicated region fallthrough
CT: control target
= control target key end

     0   :  { %8 = vsyncpa [#allocation3], 0  ;;  %s986_s0 = inlined_call_operand.hbm [shape: f32[8,1024], index: 0, kind: input, shape index: {}]   ;;  %s987_s1 = inlined_call_operand.vmem [shape: f32[8,4], index: 1, kind: input, shape index: {}]   ;;  %s988_s2 = inlined_call_operand.hbm [shape: f32[256,128], index: 2, kind: input, shape index: {}]   ;;  %s989_s3 = inlined_call_operand.hbm [shape: f32[1,64,128], index: 3, kind: output, shape index: {}]  }
   0x1   :  { %9 = vsyncpa [#allocation5], 0 }
   0x2   :  { %10 = vsyncpa [#allocation8], 0 }
   0x3   :  { %11 = vsyncpa [#allocation4], 0  ;;  %s28_s14 = sshll.u32 %s987_s1, 4  ;;  %s714_s15 = smov [#allocation2]   ;;  %s29_s14 = int_to_ptr.vmem [resolvable:$true] %s28_s14 }
   0x4   :  { %s18_s16 = sshll.u32 %s714_s15, 4  ;;  %s19_s16 = int_to_ptr.vmem [resolvable:$true] %s18_s16 }
   0x5   :  { %s642_s17 = scalar_lea.vmem %s19_s16, 1024  ;;  %p647_p1 = scmp.lt.s32.totalorder %s19_s16, %s19_s16 }
   0x6   :  { %p643_p0 = scmp.ne.s32.totalorder %s19_s16, %s642_s17  ;;  %p648_p2 = scmp.lt.s32.totalorder %s642_s17, %s642_s17 }
   0x8   :  { %p649_p3 = por %p648_p2, %p647_p1 }
   0xa   :  { %p650_p4 = pnand %p649_p3, %p643_p0 }
   0xc   :  { %653 = shalt.err (!%p650_p4)
}
   0xd   :  { %21 = dma.hbm_to_vmem [thread:$0]  %s986_s0, 1024, %s19_s16, [#allocation3]  }
   0xe   :  { %s654_s20 = scalar_lea.vmem %s29_s14, 128  ;;  %p659_p6 = scmp.lt.s32.totalorder %s29_s14, %s29_s14 }
   0xf   :  { %p655_p5 = scmp.ne.s32.totalorder %s29_s14, %s654_s20  ;;  %p660_p7 = scmp.lt.s32.totalorder %s654_s20, %s654_s20 }
  0x11   :  { %p661_p8 = por %p660_p7, %p659_p6 }
  0x13   :  { %p662_p9 = pnand %p661_p8, %p655_p5 }
  0x15   :  { %665 = shalt.err (!%p662_p9)
}
  0x16   :  { %s715_s1 = smov [#allocation6]   ;;  %s716_s21 = smov [#allocation7]  }
  0x17   :  { %31 = dma.vmem_to_smem %s29_s14, 128, %s715_s1, [#allocation5]  }
  0x18   :  { %s37_s22 = sshll.u32 %s716_s21, 4  ;;  %s38_s22 = int_to_ptr.vmem [resolvable:$true] %s37_s22 }
  0x19   :  { %s674_s23 = scalar_lea.vmem %s38_s22, 4096  ;;  %p679_p11 = scmp.lt.s32.totalorder %s38_s22, %s38_s22 }
  0x1a   :  { %p675_p10 = scmp.ne.s32.totalorder %s38_s22, %s674_s23  ;;  %p680_p12 = scmp.lt.s32.totalorder %s674_s23, %s674_s23 }
  0x1c   :  { %p681_p13 = por %p680_p12, %p679_p11 }
  0x1e   :  { %p682_p0 = pnand %p681_p13, %p675_p10 }
  0x20   :  { %685 = shalt.err (!%p682_p0)
}
  0x21   :  { %s717_s0 = smov 128   ;;  %s718_s24 = smov 8  }
  0x22   :  { %43 = dma.hbm_to_vmem [thread:$0]  %s988_s2, 4096, %s38_s22, [#allocation8], %s717_s0, %s717_s0, %s718_s24  }
  0x23   :  { %706 = dma.done.wait [#allocation3], 1024  }
  0x24   :  { %707 = vsyncadd [#allocation3], 4294966272 }
  0x25   :  { %708 = dma.done.wait [#allocation5], 128  }
  0x26   :  { %709 = vsyncadd [#allocation5], 4294967168 }
  0x27   :  { %710 = dma.done.wait [#allocation8], 4096  }
  0x28   :  { %711 = vsyncadd [#allocation8], 4294963200 }
  0x29   :  { %53 = sfence }
  0x2a   :  { %s62_s27 = sld [smem:[#allocation6]]  ;;  %v752_v0 = vld [vmem:[#allocation2] sm:$0xff]  ;;  %v754_v1 = vld [vmem:[#allocation2 + $0x8] sm:$0xff]  ;;  %v758_v2 = vld [vmem:[#allocation2 + $0x10] sm:$0xff] }
  0x2b   :  { %s475_s28 = sld [smem:[#allocation6 + $0x1]]  ;;  %v760_v3 = vld [vmem:[#allocation2 + $0x18] sm:$0xff]  ;;  %v764_v4 = vld [vmem:[#allocation2 + $0x20] sm:$0xff]  ;;  %v766_v5 = vld [vmem:[#allocation2 + $0x28] sm:$0xff] }
  0x2c   :  { %s476_s29 = sld [smem:[#allocation6 + $0x2]]  ;;  %v770_v7 = vld [vmem:[#allocation2 + $0x30] sm:$0xff]  ;;  %v776_v11 = vld [vmem:[#allocation2 + $0x38] sm:$0xff] }
  0x2d   :  { %s477_s30 = sld [smem:[#allocation6 + $0x3]] }
  0x2e   :  { %s756_s4 = sld [smem:[#allocation6 + $0x80]] }
  0x2f   :  { %s762_s2 = sld [smem:[#allocation6 + $0x81]] }
  0x30   :  { %v63_v6 = vstv %s62_s27  ;;  %s768_s5 = sld [smem:[#allocation6 + $0x82]] }
  0x31   :  { %v64_v8 = vmul.f32 %v63_v6, %v752_v0  ;;  %v65_v9 = vmul.f32 %v63_v6, %v754_v1  ;;  %v67_v10 = vstv %s475_s28  ;;  %s774_s6 = sld [smem:[#allocation6 + $0x83]] }
  0x32   :  { %v68_v12 = vmul.f32 %v67_v10, %v758_v2  ;;  %v69_v13 = vmul.f32 %v67_v10, %v760_v3  ;;  %v73_v14 = vstv %s476_s29  ;;  %s780_s7 = sld [smem:[#allocation6 + $0x100]] }
  0x33   :  { %v74_v15 = vmul.f32 %v73_v14, %v764_v4  ;;  %v75_v16 = vmul.f32 %v73_v14, %v766_v5  ;;  %v79_v17 = vstv %s477_s30  ;;  %s784_s8 = sld [smem:[#allocation6 + $0x101]] }
  0x34   :  { %v70_v18 = vadd.f32 %v68_v12, %v64_v8  ;;  %v71_v19 = vadd.f32 %v69_v13, %v65_v9  ;;  %v80_v20 = vmul.f32 %v79_v17, %v770_v7  ;;  %s787_s9 = sld [smem:[#allocation6 + $0x102]]  ;;  %v81_v21 = vmul.f32 %v79_v17, %v776_v11 }
  0x35   :  { %v85_v22 = vstv %s756_s4  ;;  %v89_v23 = vstv %s762_s2  ;;  %s792_s10 = sld [smem:[#allocation6 + $0x103]]  ;;  %s719_s2 = smov [#allocation9]  }
  0x36   :  { %v76_v24 = vadd.f32 %v74_v15, %v70_v18  ;;  %v77_v25 = vadd.f32 %v75_v16, %v71_v19  ;;  %v86_v26 = vmul.f32 %v85_v22, %v752_v0  ;;  %v87_v27 = vmul.f32 %v85_v22, %v754_v1  ;;  %s796_s11 = sld [smem:[#allocation6 + $0x180]] }
  0x37   :  { %v90_v28 = vmul.f32 %v89_v23, %v758_v2  ;;  %v91_v29 = vmul.f32 %v89_v23, %v760_v3  ;;  %v95_v30 = vstv %s768_s5  ;;  %v101_v31 = vstv %s774_s6  ;;  %s802_s12 = sld [smem:[#allocation6 + $0x181]]  ;;  %s461_s5 = sshll.u32 %s719_s2, 4  ;;  %s462_s5 = int_to_ptr.vmem [resolvable:$true] %s461_s5 }
  0x38   :  { %v804_v32 = vadd.f32 %v80_v20, %v76_v24  ;;  %v96_v33 = vmul.f32 %v95_v30, %v764_v4  ;;  %v97_v34 = vmul.f32 %v95_v30, %v766_v5  ;;  %s808_s13 = sld [smem:[#allocation6 + $0x182]]  ;;  %v102_v37 = vmul.f32 %v101_v31, %v770_v7  ;;  %s686_s6 = scalar_lea.vmem %s462_s5, 1024 }
  0x39   :  { %v92_v35 = vadd.f32 %v90_v28, %v86_v26  ;;  %v93_v36 = vadd.f32 %v91_v29, %v87_v27  ;;  %v103_v38 = vmul.f32 %v101_v31, %v776_v11  ;;  %s812_s14 = sld [smem:[#allocation6 + $0x183]]  ;;  %v814_v39 = vadd.f32 %v81_v21, %v77_v25  ;;  %p687_p1 = scmp.ne.s32.totalorder %s462_s5, %s686_s6 }
  0x3a   :  { %v107_v40 = vstv %s780_s7  ;;  %v111_v41 = vstv %s784_s8  ;;  %v117_v42 = vstv %s787_s9  ;;  %s819_s15 = sld [smem:[#allocation6 + $0x200]]  ;;  %p691_p2 = scmp.lt.s32.totalorder %s462_s5, %s462_s5 }
  0x3b   :  { %v98_v43 = vadd.f32 %v96_v33, %v92_v35  ;;  %v99_v44 = vadd.f32 %v97_v34, %v93_v36  ;;  %v108_v45 = vmul.f32 %v107_v40, %v752_v0  ;;  %v109_v46 = vmul.f32 %v107_v40, %v754_v1  ;;  %s823_s16 = sld [smem:[#allocation6 + $0x201]]  ;;  %p692_p3 = scmp.lt.s32.totalorder %s686_s6, %s686_s6 }
  0x3c   :  { %v112_v47 = vmul.f32 %v111_v41, %v758_v2  ;;  %v113_v48 = vmul.f32 %v111_v41, %v760_v3  ;;  %v118_v49 = vmul.f32 %v117_v42, %v764_v4  ;;  %v119_v50 = vmul.f32 %v117_v42, %v766_v5  ;;  %s829_s17 = sld [smem:[#allocation6 + $0x202]] }
  0x3d   :  { %v831_v51 = vadd.f32 %v102_v37, %v98_v43  ;;  %v833_v52 = vadd.f32 %v103_v38, %v99_v44  ;;  %v123_v53 = vstv %s792_s10  ;;  %v129_v54 = vstv %s796_s11  ;;  %s837_s18 = sld [smem:[#allocation6 + $0x203]]  ;;  %p693_p4 = por %p692_p3, %p691_p2 }
  0x3e   :  { %v114_v55 = vadd.f32 %v112_v47, %v108_v45  ;;  %v115_v56 = vadd.f32 %v113_v48, %v109_v46  ;;  %v124_v57 = vmul.f32 %v123_v53, %v770_v7  ;;  %v125_v58 = vmul.f32 %v123_v53, %v776_v11  ;;  %s841_s19 = sld [smem:[#allocation6 + $0x280]] }
  0x3f   :  { %v130_v59 = vmul.f32 %v129_v54, %v752_v0  ;;  %v131_v60 = vmul.f32 %v129_v54, %v754_v1  ;;  %v133_v61 = vstv %s802_s12  ;;  %v139_v62 = vstv %s808_s13  ;;  %s847_s20 = sld [smem:[#allocation6 + $0x281]]  ;;  %p694_p5 = pnand %p693_p4, %p687_p1 }
  0x40   :  { %v120_v63 = vadd.f32 %v118_v49, %v114_v55  ;;  %v121_v6 = vadd.f32 %v119_v50, %v115_v56  ;;  %v134_v8 = vmul.f32 %v133_v61, %v758_v2  ;;  %v135_v9 = vmul.f32 %v133_v61, %v760_v3  ;;  %s851_s1 = sld [smem:[#allocation6 + $0x282]] }
  0x41   :  { %v140_v10 = vmul.f32 %v139_v62, %v764_v4  ;;  %v141_v12 = vmul.f32 %v139_v62, %v766_v5  ;;  %v145_v13 = vstv %s812_s14  ;;  %v151_v14 = vstv %s819_s15  ;;  %s857_s21 = sld [smem:[#allocation6 + $0x283]] }
  0x42   :  { %v859_v15 = vadd.f32 %v124_v57, %v120_v63  ;;  %v861_v16 = vadd.f32 %v125_v58, %v121_v6  ;;  %v136_v17 = vadd.f32 %v134_v8, %v130_v59  ;;  %v137_v18 = vadd.f32 %v135_v9, %v131_v60  ;;  %s863_s22 = sld [smem:[#allocation6 + $0x300]] }
  0x43   :  { %v146_v19 = vmul.f32 %v145_v13, %v770_v7  ;;  %v147_v20 = vmul.f32 %v145_v13, %v776_v11  ;;  %v152_v21 = vmul.f32 %v151_v14, %v752_v0  ;;  %v153_v22 = vmul.f32 %v151_v14, %v754_v1  ;;  %s871_s23 = sld [smem:[#allocation6 + $0x301]] }
  0x44   :  { %v142_v23 = vadd.f32 %v140_v10, %v136_v17  ;;  %v143_v24 = vadd.f32 %v141_v12, %v137_v18  ;;  %v155_v25 = vstv %s823_s16  ;;  %v161_v26 = vstv %s829_s17  ;;  %s877_s25 = sld [smem:[#allocation6 + $0x302]] }
  0x45   :  { %v156_v27 = vmul.f32 %v155_v25, %v758_v2  ;;  %v157_v28 = vmul.f32 %v155_v25, %v760_v3  ;;  %v162_v29 = vmul.f32 %v161_v26, %v764_v4  ;;  %v163_v30 = vmul.f32 %v161_v26, %v766_v5  ;;  %s885_s26 = sld [smem:[#allocation6 + $0x303]] }
  0x46   :  { %v879_v31 = vadd.f32 %v146_v19, %v142_v23  ;;  %v881_v33 = vadd.f32 %v147_v20, %v143_v24  ;;  %v167_v34 = vstv %s837_s18  ;;  %v173_v35 = vstv %s841_s19  ;;  %s889_s27 = sld [smem:[#allocation6 + $0x380]] }
  0x47   :  { %v158_v36 = vadd.f32 %v156_v27, %v152_v21  ;;  %v159_v37 = vadd.f32 %v157_v28, %v153_v22  ;;  %v168_v38 = vmul.f32 %v167_v34, %v770_v7  ;;  %v169_v40 = vmul.f32 %v167_v34, %v776_v11  ;;  %s895_s28 = sld [smem:[#allocation6 + $0x381]] }
  0x48   :  { %v174_v41 = vmul.f32 %v173_v35, %v752_v0  ;;  %v175_v42 = vmul.f32 %v173_v35, %v754_v1  ;;  %v177_v43 = vstv %s847_s20  ;;  %v183_v44 = vstv %s851_s1  ;;  %s899_s29 = sld [smem:[#allocation6 + $0x382]] }
  0x49   :  { %v164_v45 = vadd.f32 %v162_v29, %v158_v36  ;;  %v165_v46 = vadd.f32 %v163_v30, %v159_v37  ;;  %v178_v47 = vmul.f32 %v177_v43, %v758_v2  ;;  %v179_v48 = vmul.f32 %v177_v43, %v760_v3  ;;  %s909_s30 = sld [smem:[#allocation6 + $0x383]] }
  0x4a   :  { %v184_v49 = vmul.f32 %v183_v44, %v764_v4  ;;  %v185_v50 = vmul.f32 %v183_v44, %v766_v5  ;;  %v189_v53 = vstv %s857_s21  ;;  %v195_v54 = vstv %s863_s22 }
  0x4b   :  { %v905_v55 = vadd.f32 %v168_v38, %v164_v45  ;;  %v907_v56 = vadd.f32 %v169_v40, %v165_v46  ;;  %v180_v57 = vadd.f32 %v178_v47, %v174_v41  ;;  %v181_v58 = vadd.f32 %v179_v48, %v175_v42 }
  0x4c   :  { %v190_v59 = vmul.f32 %v189_v53, %v770_v7  ;;  %v191_v60 = vmul.f32 %v189_v53, %v776_v11  ;;  %v196_v61 = vmul.f32 %v195_v54, %v752_v0  ;;  %v197_v62 = vmul.f32 %v195_v54, %v754_v1 }
  0x4d   :  { %v186_v63 = vadd.f32 %v184_v49, %v180_v57  ;;  %v187_v6 = vadd.f32 %v185_v50, %v181_v58  ;;  %v199_v8 = vstv %s871_s23  ;;  %v205_v9 = vstv %s877_s25 }
  0x4e   :  { %v200_v10 = vmul.f32 %v199_v8, %v758_v2  ;;  %v201_v12 = vmul.f32 %v199_v8, %v760_v3  ;;  %v206_v13 = vmul.f32 %v205_v9, %v764_v4  ;;  %v207_v14 = vmul.f32 %v205_v9, %v766_v5  ;;  %v340_v8 = vld [vmem:[#allocation7 + $0xe8] sm:$0xff] }
  0x4f   :  { %v921_v17 = vadd.f32 %v190_v59, %v186_v63  ;;  %v923_v18 = vadd.f32 %v191_v60, %v187_v6  ;;  %v211_v19 = vstv %s885_s26  ;;  %v217_v20 = vstv %s889_s27  ;;  %v341_v63 = vld [vmem:[#allocation7 + $0xf0] sm:$0xff]  ;;  %v324_v9 = vld [vmem:[#allocation7 + $0x68] sm:$0xff] }
  0x50   :  { %v202_v21 = vadd.f32 %v200_v10, %v196_v61  ;;  %v203_v22 = vadd.f32 %v201_v12, %v197_v62  ;;  %v212_v23 = vmul.f32 %v211_v19, %v770_v7  ;;  %v213_v24 = vmul.f32 %v211_v19, %v776_v11  ;;  %v342_v61 = vld [vmem:[#allocation7 + $0xf8] sm:$0xff]  ;;  %v325_v6 = vld [vmem:[#allocation7 + $0x70] sm:$0xff]  ;;  %v339_v10 = vld [vmem:[#allocation7 + $0xe0] sm:$0xff] }
  0x51   :  { %v218_v25 = vmul.f32 %v217_v20, %v752_v0  ;;  %v219_v26 = vmul.f32 %v217_v20, %v754_v1  ;;  %v221_v27 = vstv %s895_s28  ;;  %v227_v28 = vstv %s899_s29  ;;  %v326_v62 = vld [vmem:[#allocation7 + $0x78] sm:$0xff]  ;;  %506 = vmatprep.subr.mxu0 %v342_v61  ;;  %562 = vmatprep.subr.mxu1 %v342_v61  ;;  %v323_v12 = vld [vmem:[#allocation7 + $0x60] sm:$0xff]  ;;  %v337_v19 = vld [vmem:[#allocation7 + $0xd0] sm:$0xff] }
  0x52   :  { %v208_v29 = vadd.f32 %v206_v13, %v202_v21  ;;  %v209_v30 = vadd.f32 %v207_v14, %v203_v22  ;;  %v222_v34 = vmul.f32 %v221_v27, %v758_v2  ;;  %v223_v35 = vmul.f32 %v221_v27, %v760_v3  ;;  %507 = vmatpush3.msra.mxu0 %v326_v62  ;;  %v338_v13 = vld [vmem:[#allocation7 + $0xd8] sm:$0xff]  ;;  %v321_v20 = vld [vmem:[#allocation7 + $0x50] sm:$0xff]  ;;  %v336_v21 = vld [vmem:[#allocation7 + $0xc8] sm:$0xff] }
  0x53   :  { %v228_v36 = vmul.f32 %v227_v28, %v764_v4  ;;  %v229_v37 = vmul.f32 %v227_v28, %v766_v5  ;;  %v233_v38 = vstv %s909_s30  ;;  %v238_v40 = vmax.f32 %v804_v32, %v859_v15  ;;  %578 = vmatpush3.msra.mxu1 %v326_v62  ;;  %508 = vmatprep.subr.mxu0 %v341_v63  ;;  %v322_v14 = vld [vmem:[#allocation7 + $0x58] sm:$0xff]  ;;  %v320_v22 = vld [vmem:[#allocation7 + $0x48] sm:$0xff]  ;;  %v333_v27 = vld [vmem:[#allocation7 + $0xb0] sm:$0xff] }
  0x54   :  { %v940_v41 = vadd.f32 %v212_v23, %v208_v29  ;;  %v942_v0 = vadd.f32 %v213_v24, %v209_v30  ;;  %v224_v1 = vadd.f32 %v222_v34, %v218_v25  ;;  %v225_v42 = vadd.f32 %v223_v35, %v219_v26  ;;  %563 = vmatprep.subr.mxu1 %v341_v63  ;;  %v335_v23 = vld [vmem:[#allocation7 + $0xc0] sm:$0xff]  ;;  %v334_v25 = vld [vmem:[#allocation7 + $0xb8] sm:$0xff]  ;;  %v317_v28 = vld [vmem:[#allocation7 + $0x30] sm:$0xff] }
  0x55   :  { %v234_v43 = vmul.f32 %v233_v38, %v770_v7  ;;  %v235_v2 = vmul.f32 %v233_v38, %v776_v11  ;;  %v239_v3 = vmax.f32 %v814_v39, %v861_v16  ;;  %v240_v4 = vmax.f32 %v831_v51, %v879_v31  ;;  %509 = vmatpush3.msra.mxu0 %v325_v6  ;;  %v319_v24 = vld [vmem:[#allocation7 + $0x40] sm:$0xff]  ;;  %v318_v26 = vld [vmem:[#allocation7 + $0x38] sm:$0xff]  ;;  %v332_v29 = vld [vmem:[#allocation7 + $0xa8] sm:$0xff] }
  0x56   :  { %v230_v5 = vadd.f32 %v228_v36, %v224_v1  ;;  %v231_v44 = vadd.f32 %v229_v37, %v225_v42  ;;  %v241_v45 = vmax.f32 %v833_v52, %v881_v33  ;;  %v242_v46 = vmax.f32 %v238_v40, %v905_v55  ;;  %579 = vmatpush3.msra.mxu1 %v325_v6  ;;  %v316_v30 = vld [vmem:[#allocation7 + $0x28] sm:$0xff]  ;;  %v331_v34 = vld [vmem:[#allocation7 + $0xa0] sm:$0xff]  ;;  %v330_v36 = vld [vmem:[#allocation7 + $0x98] sm:$0xff] }
  0x57   :  { %v243_v47 = vmax.f32 %v239_v3, %v907_v56  ;;  %v244_v48 = vmax.f32 %v240_v4, %v921_v17  ;;  %510 = vmatprep.subr.mxu0 %v340_v8  ;;  %564 = vmatprep.subr.mxu1 %v340_v8  ;;  %v315_v35 = vld [vmem:[#allocation7 + $0x20] sm:$0xff]  ;;  %v314_v37 = vld [vmem:[#allocation7 + $0x18] sm:$0xff]  ;;  %v329_v38 = vld [vmem:[#allocation7 + $0x90] sm:$0xff] }
  0x58   :  { %v955_v7 = vadd.f32 %v234_v43, %v230_v5  ;;  %v957_v11 = vadd.f32 %v235_v2, %v231_v44  ;;  %v245_v49 = vmax.f32 %v241_v45, %v923_v18  ;;  %v246_v50 = vmax.f32 %v242_v46, %v940_v41  ;;  %511 = vmatpush3.msra.mxu0 %v324_v9  ;;  %v313_v40 = vld [vmem:[#allocation7 + $0x10] sm:$0xff]  ;;  %v328_v1 = vld [vmem:[#allocation7 + $0x88] sm:$0xff]  ;;  %v327_v43 = vld [vmem:[#allocation7 + $0x80] sm:$0xff] }
  0x59   :  { %v247_v53 = vmax.f32 %v243_v47, %v942_v0  ;;  %580 = vmatpush3.msra.mxu1 %v324_v9  ;;  %512 = vmatprep.subr.mxu0 %v339_v10  ;;  %v312_v42 = vld [vmem:[#allocation7 + $0x8] sm:$0xff]  ;;  %v311_v2 = vld [vmem:[#allocation7] sm:$0xff] }
  0x5a   :  { %v248_v54 = vmax.f32 %v244_v48, %v955_v7  ;;  %v249_v57 = vmax.f32 %v245_v49, %v957_v11  ;;  %565 = vmatprep.subr.mxu1 %v339_v10  ;;  %513 = vmatpush3.msra.mxu0 %v323_v12 }
  0x5b   :  { %v250_v58 = vmax.f32 %v246_v50, %v247_v53  ;;  %581 = vmatpush3.msra.mxu1 %v323_v12  ;;  %514 = vmatprep.subr.mxu0 %v338_v13 }
  0x5c   :  { %v251_v59 = vmax.f32 %v248_v54, %v249_v57  ;;  %566 = vmatprep.subr.mxu1 %v338_v13  ;;  %515 = vmatpush3.msra.mxu0 %v322_v14 }
  0x5d   :  { %582 = vmatpush3.msra.mxu1 %v322_v14  ;;  %516 = vmatprep.subr.mxu0 %v337_v19 }
  0x5e   :  { %v252_v60 = vmax.f32 %v250_v58, %v251_v59  ;;  %567 = vmatprep.subr.mxu1 %v337_v19  ;;  %517 = vmatpush3.msra.mxu0 %v321_v20 }
  0x5f   :  { %583 = vmatpush3.msra.mxu1 %v321_v20  ;;  %518 = vmatprep.subr.mxu0 %v336_v21 }
  0x60   :  { %253 = vmax.xlane.f32.xlu0 %v252_v60  ;;  %568 = vmatprep.subr.mxu1 %v336_v21 }
  0x61   :  { %519 = vmatpush3.msra.mxu0 %v320_v22  ;;  %584 = vmatpush3.msra.mxu1 %v320_v22 }
  0x62   :  { %520 = vmatprep.subr.mxu0 %v335_v23  ;;  %569 = vmatprep.subr.mxu1 %v335_v23 }
  0x63   :  { %521 = vmatpush3.msra.mxu0 %v319_v24  ;;  %585 = vmatpush3.msra.mxu1 %v319_v24 }
  0x64   :  { %522 = vmatprep.subr.mxu0 %v334_v25  ;;  %570 = vmatprep.subr.mxu1 %v334_v25 }
  0x65   :  { %523 = vmatpush3.msra.mxu0 %v318_v26  ;;  %586 = vmatpush3.msra.mxu1 %v318_v26 }
  0x66   :  { %524 = vmatprep.subr.mxu0 %v333_v27  ;;  %571 = vmatprep.subr.mxu1 %v333_v27 }
  0x67   :  { %525 = vmatpush3.msra.mxu0 %v317_v28  ;;  %587 = vmatpush3.msra.mxu1 %v317_v28 }
  0x68   :  { %526 = vmatprep.subr.mxu0 %v332_v29  ;;  %572 = vmatprep.subr.mxu1 %v332_v29 }
  0x69   :  { %527 = vmatpush3.msra.mxu0 %v316_v30  ;;  %588 = vmatpush3.msra.mxu1 %v316_v30 }
  0x6a   :  { %528 = vmatprep.subr.mxu0 %v331_v34  ;;  %573 = vmatprep.subr.mxu1 %v331_v34 }
  0x6b   :  { %529 = vmatpush3.msra.mxu0 %v315_v35  ;;  %589 = vmatpush3.msra.mxu1 %v315_v35 }
  0x6c   :  { %530 = vmatprep.subr.mxu0 %v330_v36  ;;  %574 = vmatprep.subr.mxu1 %v330_v36 }
  0x6d   :  { %531 = vmatpush3.msra.mxu0 %v314_v37  ;;  %590 = vmatpush3.msra.mxu1 %v314_v37 }
  0x6e   :  { %532 = vmatprep.subr.mxu0 %v329_v38  ;;  %575 = vmatprep.subr.mxu1 %v329_v38 }
  0x6f   :  { %533 = vmatpush3.msra.mxu0 %v313_v40  ;;  %591 = vmatpush3.msra.mxu1 %v313_v40 }
  0x70   :  { %534 = vmatprep.subr.mxu0 %v328_v1  ;;  %576 = vmatprep.subr.mxu1 %v328_v1 }
  0x71   :  { %535 = vmatpush3.msra.mxu0 %v312_v42  ;;  %592 = vmatpush3.msra.mxu1 %v312_v42 }
  0x72   :  { %536 = vmatprep.subr.mxu0 %v327_v43  ;;  %577 = vmatprep.subr.mxu1 %v327_v43 }
  0x73   :  { %537 = vmatpush3.msra.mxu0 %v311_v2  ;;  %593 = vmatpush3.msra.mxu1 %v311_v2 }
  0xe9   :  { %v254_v3 = vpop.xlane.xlu0 %253 }
  0xea   :  { %v255_v4 = vrot.slane %v254_v3, 4 }
  0xec   :  { %v256_v5 = vmax.f32 %v254_v3, %v255_v4 }
  0xee   :  { %v257_v44 = vrot.slane %v256_v5, 2 }
  0xf0   :  { %v258_v45 = vmax.f32 %v256_v5, %v257_v44 }
  0xf2   :  { %v259_v46 = vrot.slane %v258_v45, 1 }
  0xf4   :  { %v260_v47 = vmax.f32 %v258_v45, %v259_v46 }
  0xf6   :  { %594 = vpush %v260_v47 }
 0x127   :  { %s595_s4 = spop %594 }
 0x128   :  { %v262_v48 = vstv %s595_s4 }
 0x129   :  { %v264_v49 = vsub.f32 %v814_v39, %v262_v48  ;;  %v272_v50 = vsub.f32 %v907_v56, %v262_v48  ;;  %v263_v53 = vsub.f32 %v804_v32, %v262_v48  ;;  %v271_v54 = vsub.f32 %v905_v55, %v262_v48 }
 0x12a   :  { %v266_v57 = vsub.f32 %v833_v52, %v262_v48  ;;  %v274_v58 = vsub.f32 %v923_v18, %v262_v48  ;;  %v265_v62 = vsub.f32 %v831_v51, %v262_v48  ;;  %v273_v6 = vsub.f32 %v921_v17, %v262_v48 }
 0x12b   :  { %v281_v59 = vmul.f32 1.442695, %v264_v49  ;;  %v297_v60 = vmul.f32 1.442695, %v272_v50  ;;  %v279_v61 = vmul.f32 1.442695, %v263_v53  ;;  %v268_v56 = vsub.f32 %v861_v16, %v262_v48 }
 0x12c   :  { %v295_v63 = vmul.f32 1.442695, %v271_v54  ;;  %v285_v39 = vmul.f32 1.442695, %v266_v57  ;;  %v301_v32 = vmul.f32 1.442695, %v274_v58  ;;  %v276_v55 = vsub.f32 %v942_v0, %v262_v48 }
 0x12d   :  { %602 = vpow2.f32 %v281_v59  ;;  %v283_v52 = vmul.f32 1.442695, %v265_v62  ;;  %v267_v18 = vsub.f32 %v859_v15, %v262_v48  ;;  %v299_v8 = vmul.f32 1.442695, %v273_v6 }
 0x12e   :  { %604 = vpow2.f32 %v297_v60  ;;  %v275_v9 = vsub.f32 %v940_v41, %v262_v48  ;;  %v289_v51 = vmul.f32 1.442695, %v268_v56  ;;  %v270_v17 = vsub.f32 %v881_v33, %v262_v48 }
 0x12f   :  { %606 = vpow2.f32 %v279_v61  ;;  %v305_v10 = vmul.f32 1.442695, %v276_v55  ;;  %v278_v16 = vsub.f32 %v957_v11, %v262_v48  ;;  %v287_v12 = vmul.f32 1.442695, %v267_v18 }
 0x130   :  { %608 = vpow2.f32 %v295_v63  ;;  %v269_v0 = vsub.f32 %v879_v31, %v262_v48  ;;  %v303_v13 = vmul.f32 1.442695, %v275_v9  ;;  %v277_v15 = vsub.f32 %v955_v7, %v262_v48 }
 0x131   :  { %610 = vpow2.f32 %v285_v39  ;;  %v293_v14 = vmul.f32 1.442695, %v270_v17  ;;  %v309_v41 = vmul.f32 1.442695, %v278_v16 }
 0x132   :  { %612 = vpow2.f32 %v301_v32  ;;  %v291_v19 = vmul.f32 1.442695, %v269_v0  ;;  %v307_v33 = vmul.f32 1.442695, %v277_v15 }
 0x133   :  { %614 = vpow2.f32 %v283_v52 }
 0x134   :  { %616 = vpow2.f32 %v299_v8 }
 0x135   :  { %618 = vpow2.f32 %v289_v51 }
 0x136   :  { %620 = vpow2.f32 %v305_v10 }
 0x137   :  { %622 = vpow2.f32 %v287_v12 }
 0x138   :  { %624 = vpow2.f32 %v303_v13 }
 0x139   :  { %626 = vpow2.f32 %v293_v14 }
 0x13a   :  { %v603_v20 = vpop.eup %602  ;;  %628 = vpow2.f32 %v309_v41 }
 0x13b   :  { %v605_v11 = vpop.eup %604  ;;  %407 = vmatprep.mubr.f32.mxu0 %v603_v20  ;;  %630 = vpow2.f32 %v291_v19 }
 0x13c   :  { %v607_v21 = vpop.eup %606  ;;  %427 = vmatprep.mubr.f32.mxu1 %v605_v11  ;;  %632 = vpow2.f32 %v307_v33 }
 0x13d   :  { %v609_v31 = vpop.eup %608  ;;  %408 = vmatmul.mubr.f32.vlgmr.msra.gmra.mxu0 %v607_v21 }
 0x13e   :  { %v611_v7 = vpop.eup %610  ;;  %428 = vmatmul.mubr.f32.vlgmr.msra.gmra.mxu1 %v609_v31 }
 0x13f   :  { %v613_v22 = vpop.eup %612  ;;  %412 = vmatprep.mubr.f32.mxu0 %v611_v7 }
 0x140   :  { %v615_v23 = vpop.eup %614  ;;  %432 = vmatprep.mubr.f32.mxu1 %v613_v22 }
 0x141   :  { %v617_v24 = vpop.eup %616  ;;  %413 = vmatmul.mubr.f32.gmra.mxu0 %v615_v23 }
 0x142   :  { %v619_v25 = vpop.eup %618  ;;  %433 = vmatmul.mubr.f32.gmra.mxu1 %v617_v24 }
 0x143   :  { %v621_v26 = vpop.eup %620  ;;  %417 = vmatprep.mubr.f32.mxu0 %v619_v25 }
 0x144   :  { %v623_v27 = vpop.eup %622  ;;  %437 = vmatprep.mubr.f32.mxu1 %v621_v26 }
 0x145   :  { %v625_v28 = vpop.eup %624  ;;  %418 = vmatmul.mubr.f32.gmra.mxu0 %v623_v27 }
 0x146   :  { %v627_v29 = vpop.eup %626  ;;  %438 = vmatmul.mubr.f32.gmra.mxu1 %v625_v28 }
 0x147   :  { %v629_v30 = vpop.eup %628  ;;  %422 = vmatprep.mubr.f32.mxu0 %v627_v29 }
 0x148   :  { %v631_v34 = vpop.eup %630  ;;  %442 = vmatprep.mubr.f32.mxu1 %v629_v30 }
 0x149   :  { %v633_v35 = vpop.eup %632  ;;  %423 = vmatmul.mubr.f32.gmra.mxu0 %v631_v34 }
 0x14a   :  { %443 = vmatmul.mubr.f32.gmra.mxu1 %v633_v35 }
 0x1fd   :  { %v538_v36 = vpop.f32.mrf.mxu0 }
 0x1fe   :  { %v550_v37 = vpop.f32.mrf.mxu1 }
 0x1ff   :  { %v539_v38 = vpop.f32.mrf.mxu0 }
 0x200   :  { %v540_v40 = vadd.f32 %v539_v38, %v538_v36  ;;  %v551_v1 = vpop.f32.mrf.mxu1 }
 0x201   :  { %v552_v42 = vadd.f32 %v551_v1, %v550_v37  ;;  %v541_v43 = vpop.f32.mrf.mxu0 }
 0x202   :  { %448 = vst [vmem:[#allocation9] sm:$0xff] %v540_v40  ;;  %v553_v2 = vpop.f32.mrf.mxu1 }
 0x203   :  { %452 = vst [vmem:[#allocation9 + $0x20] sm:$0xff] %v552_v42  ;;  %v542_v3 = vpop.f32.mrf.mxu0 }
 0x204   :  { %v543_v4 = vadd.f32 %v542_v3, %v541_v43  ;;  %v554_v5 = vpop.f32.mrf.mxu1 }
 0x205   :  { %v555_v44 = vadd.f32 %v554_v5, %v553_v2  ;;  %v544_v45 = vpop.f32.mrf.mxu0 }
 0x206   :  { %449 = vst [vmem:[#allocation9 + $0x8] sm:$0xff] %v543_v4  ;;  %v556_v46 = vpop.f32.mrf.mxu1 }
 0x207   :  { %453 = vst [vmem:[#allocation9 + $0x28] sm:$0xff] %v555_v44  ;;  %v545_v47 = vpop.f32.mrf.mxu0 }
 0x208   :  { %v546_v48 = vadd.f32 %v545_v47, %v544_v45  ;;  %v557_v49 = vpop.f32.mrf.mxu1 }
 0x209   :  { %v558_v50 = vadd.f32 %v557_v49, %v556_v46  ;;  %v547_v53 = vpop.f32.mrf.mxu0 }
 0x20a   :  { %450 = vst [vmem:[#allocation9 + $0x10] sm:$0xff] %v546_v48  ;;  %v559_v54 = vpop.f32.mrf.mxu1 }
 0x20b   :  { %454 = vst [vmem:[#allocation9 + $0x30] sm:$0xff] %v558_v50  ;;  %v548_v57 = vpop.f32.mrf.mxu0 }
 0x20c   :  { %v549_v58 = vadd.f32 %v548_v57, %v547_v53  ;;  %v560_v59 = vpop.f32.mrf.mxu1 }
 0x20d   :  { %v561_v60 = vadd.f32 %v560_v59, %v559_v54 }
 0x20e   :  { %451 = vst [vmem:[#allocation9 + $0x18] sm:$0xff] %v549_v58 }
 0x20f   :  { %455 = vst [vmem:[#allocation9 + $0x38] sm:$0xff] %v561_v60 }
 0x210   :  { %697 = shalt.err (!%p694_p5)
}
 0x211   :  { %467 = dma.vmem_to_hbm [thread:$0]  %s462_s5, 1024, %s989_s3, [#allocation4], %s717_s0, %s717_s0, %s718_s24  }
 0x212   :  { %712 = dma.done.wait [#allocation4], 1024  }
 0x213   :  { %713 = vsyncadd [#allocation4], 4294966272 }
 0x214   :  { %471 = vsyncpa [#allocation3], 1 }
 0x215   :  { %472 = vsyncpa [#allocation8], 1 }
 0x216   :  { %473 = vsyncpa [#allocation4], 1 }
 0x217   :  { %474 = vsyncpa [#allocation5], 1 }

</bundles_post_ra>
